<compile_context>
chip_gen: v6e
topology: v6e:2x2x1
jax: 0.10.0
libtpu: 0.0.40
codegen_flags: <defaults>
</compile_context>

<pallas_src>
import jax
import jax.numpy as jnp
from jax.experimental import pallas as pl
from jax.experimental.pallas import tpu as pltpu

_MIB = 1024 * 1024


def _round_up(v: int, m: int) -> int:
    return ((v + m - 1) // m) * m


def _tpu_limits():
    """(vmem_capacity_bytes, tensorcores_per_chip) with conservative fallbacks."""
    vmem_cap = 64 * _MIB   # conservative (v7x-safe) default
    num_cores = 1          # conservative: never force splits if unknown
    try:
        info = pltpu.get_tpu_info()
        cap = int(getattr(info, "vmem_capacity_bytes", 0) or 0)
        if cap > 0:
            vmem_cap = cap
        for name in ("num_cores", "tensorcores_per_chip", "num_tensorcores",
                     "cores_per_chip", "core_count"):
            v = getattr(info, name, None)
            if v is not None and int(v) > 0:
                num_cores = int(v)
                break
    except Exception:
        pass
    return vmem_cap, num_cores


def _choose_tiles(rows: int, cols: int, itemsize: int, *, allow_col_tiling: bool = True):
    """Pick (tile_r, tile_c, vmem_limit_bytes) for an elementwise (rows, cols) problem."""
    vmem_cap, num_cores = _tpu_limits()
    # dtype-native sublane multiple: 8 for f32, 16 for bf16, 32 for int8/fp8
    sublane = max(8, 32 // max(1, itemsize))
    big_vmem = vmem_cap >= 100 * _MIB          # v5e/v6e (128 MiB) vs v7x (64 MiB)
    target = (4 if big_vmem else 2) * _MIB     # per-input tile bytes
    vmem_cap_limit = (64 if big_vmem else 48) * _MIB

    # Lane (column) tiling only when one minimum-height row block already blows
    # past the target (very wide hidden) — blocks stay multiples of 128 lanes.
    tile_c = cols
    if allow_col_tiling and cols > 128 and sublane * cols * itemsize > target:
        tile_c = max(128, ((target // (sublane * itemsize)) // 128) * 128)
        tile_c = min(tile_c, cols)

    tile_r = max(1, target // max(1, tile_c * itemsize))
    tile_r = max(sublane, (tile_r // sublane) * sublane)
    tile_r = min(tile_r, _round_up(rows, sublane))

    # Multi-TensorCore chips (v7x): keep >= 2 pipelined grid steps per core so
    # each core still double-buffers. Single-TC chips: never add serial steps.
    if num_cores > 1:
        c_steps = pl.cdiv(cols, tile_c)
        want = 2 * num_cores
        while pl.cdiv(rows, tile_r) * c_steps < want and tile_r > sublane:
            tile_r = max(sublane, _round_up(tile_r // 2, sublane))

    # x/y/out double-buffered (6 tiles) + f32 temporaries headroom.
    need = 6 * tile_r * tile_c * itemsize + 3 * tile_r * tile_c * 4
    vmem_limit = int(min(vmem_cap_limit, max(32 * _MIB, 2 * need)))
    return tile_r, tile_c, vmem_limit


def _lane_dense_2d(total: int, hidden: int):
    """Lane-dense 2-D factorization for a purely elementwise problem."""
    if hidden > 0 and hidden % 128 == 0:
        return total // hidden, hidden
    for k in (16, 8, 4, 2, 1):               # prefer wider lane-dense rows
        lanes = 128 * k
        if lanes <= total and total % lanes == 0:
            return total // lanes, lanes
    return max(1, total // max(1, hidden)), hidden   # ragged fallback (correct, slower)


def _silu_and_mul_kernel(x_ref, y_ref, o_ref):
    # f32 math for accuracy; sigmoid's exp goes to the EUP (kernel is HBM-bound).
    x = x_ref[...].astype(jnp.float32)
    y = y_ref[...].astype(jnp.float32)
    o_ref[...] = (x * jax.nn.sigmoid(x) * y).astype(o_ref.dtype)


def _silu_and_mul_fused_kernel(xy_ref, o_ref):
    h = o_ref.shape[-1]
    x = xy_ref[:, :h].astype(jnp.float32)
    y = xy_ref[:, h:].astype(jnp.float32)
    o_ref[...] = (x * jax.nn.sigmoid(x) * y).astype(o_ref.dtype)


def silu_and_mul(x: jax.Array, y: jax.Array, *, donate_x: bool = False) -> jax.Array:
    """SiLU(x) * y — matches the PyTorch module's forward(x, y)."""
    assert x.ndim >= 1 and x.shape == y.shape and x.dtype == y.dtype
    orig_shape = x.shape
    hidden = orig_shape[-1]
    total = x.size
    itemsize = x.dtype.itemsize

    rows2, cols2 = _lane_dense_2d(total, hidden)
    x2 = x.reshape(rows2, cols2)
    y2 = y.reshape(rows2, cols2)

    tile_r, tile_c, vmem_limit = _choose_tiles(rows2, cols2, itemsize)
    grid = (pl.cdiv(rows2, tile_r), pl.cdiv(cols2, tile_c))
    n = rows2 * cols2

    out = pl.pallas_call(
        _silu_and_mul_kernel,
        out_shape=jax.ShapeDtypeStruct((rows2, cols2), x.dtype),
        grid_spec=pltpu.PrefetchScalarGridSpec(
            num_scalar_prefetch=0,
            grid=grid,
            in_specs=[
                pl.BlockSpec((tile_r, tile_c), lambda i, j: (i, j)),
                pl.BlockSpec((tile_r, tile_c), lambda i, j: (i, j)),
            ],
            out_specs=pl.BlockSpec((tile_r, tile_c), lambda i, j: (i, j)),
        ),
        compiler_params=pltpu.CompilerParams(
            dimension_semantics=("parallel", "parallel"),
            vmem_limit_bytes=vmem_limit,
        ),
        cost_estimate=pl.CostEstimate(
            flops=4 * n, transcendentals=n, bytes_accessed=3 * n * itemsize),
        input_output_aliases=({0: 0} if donate_x else {}),
    )(x2, y2)
    return out.reshape(orig_shape)


def silu_and_mul_fused(xy: jax.Array) -> jax.Array:
    """SiLU(xy[..., :h]) * xy[..., h:] on the packed gate||up tensor (one HBM read)."""
    assert xy.ndim >= 1 and xy.shape[-1] % 2 == 0
    hidden = xy.shape[-1] // 2
    rows = xy.size // (2 * hidden)
    itemsize = xy.dtype.itemsize
    xy2 = xy.reshape(rows, 2 * hidden)

    tile_r, _, vmem_limit = _choose_tiles(rows, 2 * hidden, itemsize, allow_col_tiling=False)
    if 8 * tile_r * 2 * hidden * itemsize > vmem_limit:
        # Pathologically wide hidden for this part's VMEM: fall back to the
        # sliced two-argument path (correct; costs the slice copies).
        return silu_and_mul(xy[..., :hidden], xy[..., hidden:])

    n = rows * hidden
    out = pl.pallas_call(
        _silu_and_mul_fused_kernel,
        out_shape=jax.ShapeDtypeStruct((rows, hidden), xy.dtype),
        grid_spec=pltpu.PrefetchScalarGridSpec(
            num_scalar_prefetch=0,
            grid=(pl.cdiv(rows, tile_r),),
            in_specs=[pl.BlockSpec((tile_r, 2 * hidden), lambda i: (i, 0))],
            out_specs=pl.BlockSpec((tile_r, hidden), lambda i: (i, 0)),
        ),
        compiler_params=pltpu.CompilerParams(
            dimension_semantics=("parallel",),
            vmem_limit_bytes=vmem_limit,
        ),
        cost_estimate=pl.CostEstimate(
            flops=4 * n, transcendentals=n, bytes_accessed=3 * n * itemsize),
    )(xy2)
    return out.reshape(*xy.shape[:-1], hidden)


if __name__ == "__main__":
    key = jax.random.PRNGKey(0)
    k = jax.random.split(key, 8)

    # 1) small [seq, hidden] f32, lane-dense hidden
    x = jax.random.normal(k[0], (8, 256), dtype=jnp.float32)
    y = jax.random.normal(k[1], (8, 256), dtype=jnp.float32)
    out = silu_and_mul(x, y)
    jax.block_until_ready(out)
    ref = jax.nn.silu(x) * y
    assert out.shape == ref.shape and out.dtype == ref.dtype
    assert jnp.allclose(out, ref, atol=1e-5, rtol=1e-5)

    # 2) ragged row count, hidden multiple of 128 (masked last row block)
    x2 = jax.random.normal(k[2], (37, 384), dtype=jnp.float32)
    y2 = jax.random.normal(k[3], (37, 384), dtype=jnp.float32)
    out2 = silu_and_mul(x2, y2)
    jax.block_until_ready(out2)
    ref2 = jax.nn.silu(x2) * y2
    assert jnp.allclose(out2, ref2, atol=1e-5, rtol=1e-5)

    # 3) leading batch dims + bf16 (16-row sublane alignment path)
    xb = jax.random.normal(k[4], (2, 6, 256), dtype=jnp.bfloat16)
    yb = jax.random.normal(k[5], (2, 6, 256), dtype=jnp.bfloat16)
    outb = silu_and_mul(xb, yb)
    jax.block_until_ready(outb)
    refb = jax.nn.silu(xb.astype(jnp.float32)) * yb.astype(jnp.float32)
    assert outb.shape == xb.shape and outb.dtype == xb.dtype
    assert jnp.allclose(outb.astype(jnp.float32), refb, atol=2e-2, rtol=2e-2)

    # 4) hidden not a multiple of 128 and not lane-repackable (ragged fallback)
    xc = jax.random.normal(k[6], (10, 96), dtype=jnp.float32)
    yc = jax.random.normal(k[7], (10, 96), dtype=jnp.float32)
    outc = silu_and_mul(xc, yc)
    jax.block_until_ready(outc)
    refc = jax.nn.silu(xc) * yc
    assert jnp.allclose(outc, refc, atol=1e-5, rtol=1e-5)

    # 5) fused [seq, 2*hidden] gate||up entry point
    xy = jnp.concatenate([x, y], axis=-1)  # (8, 512)
    outf = silu_and_mul_fused(xy)
    jax.block_until_ready(outf)
    assert outf.shape == ref.shape and outf.dtype == ref.dtype
    assert jnp.allclose(outf, ref, atol=1e-5, rtol=1e-5)

    print("KERNEL_OK")
</pallas_src>

<mosaic_0001>
module attributes {stable_mosaic.version = 11 : i64} {
  func.func @_silu_and_mul_kernel(%arg0: i32, %arg1: i32, %arg2: memref<8x256xf32, #tpu.memory_space<vmem>>, %arg3: memref<8x256xf32, #tpu.memory_space<vmem>>, %arg4: memref<8x256xf32, #tpu.memory_space<vmem>>) attributes {dimension_semantics = [#tpu.dimension_semantics<parallel>, #tpu.dimension_semantics<parallel>], iteration_bounds = array<i64: 1, 1>, scalar_prefetch = 0 : i64, scratch_operands = 0 : i64, tpu.core_type = #tpu.core_type<tc>, window_params = [{transform_indices = @transform_0, window_bounds = array<i64: 8, 256>}, {transform_indices = @transform_1, window_bounds = array<i64: 8, 256>}, {transform_indices = @transform_2, window_bounds = array<i64: 8, 256>}]} {
    %c0 = arith.constant 0 : index
    %c0_0 = arith.constant 0 : index
    %0 = vector.load %arg2[%c0, %c0_0] : memref<8x256xf32, #tpu.memory_space<vmem>>, vector<8x256xf32>
    %c0_1 = arith.constant 0 : index
    %c0_2 = arith.constant 0 : index
    %1 = vector.load %arg3[%c0_1, %c0_2] : memref<8x256xf32, #tpu.memory_space<vmem>>, vector<8x256xf32>
    %2 = arith.negf %0 : vector<8x256xf32>
    %3 = math.exp %2 : vector<8x256xf32>
    %cst = arith.constant 1.000000e+00 : f32
    %4 = vector.broadcast %cst : f32 to vector<8x256xf32>
    %5 = arith.addf %4, %3 : vector<8x256xf32>
    %6 = arith.divf %4, %5 : vector<8x256xf32>
    %7 = arith.mulf %0, %6 : vector<8x256xf32>
    %8 = arith.mulf %7, %1 : vector<8x256xf32>
    %c0_3 = arith.constant 0 : index
    %c0_4 = arith.constant 0 : index
    %9 = vector.load %arg4[%c0_3, %c0_4] : memref<8x256xf32, #tpu.memory_space<vmem>>, vector<8x256xf32>
    tpu.vector_store %arg4[%c0_3, %c0_4], %8 {strides = array<i32>} : memref<8x256xf32, #tpu.memory_space<vmem>>, vector<8x256xf32>,
    return
  }
  func.func @transform_0(%arg0: i32, %arg1: i32) -> (i32, i32) {
    %c0_i32 = arith.constant 0 : i32
    return %arg0, %arg1 : i32, i32
  }
  func.func @transform_1(%arg0: i32, %arg1: i32) -> (i32, i32) {
    %c0_i32 = arith.constant 0 : i32
    return %arg0, %arg1 : i32, i32
  }
  func.func @transform_2(%arg0: i32, %arg1: i32) -> (i32, i32) {
    %c0_i32 = arith.constant 0 : i32
    return %arg0, %arg1 : i32, i32
  }
}

</mosaic_0001>

<bundles_post_ra>
// kernel: tpu_custom_call.1
= control target key start
LH: loop header
LB: loop body
LE: loop exit
PB: predicated region body
PF: predicated region fallthrough
CT: control target
= control target key end

     0   :  { %7 = vsyncpa [#allocation3], 0  ;;  %s180_s0 = inlined_call_operand.hbm [shape: f32[8,256], index: 0, kind: input, shape index: {}]   ;;  %s181_s1 = inlined_call_operand.hbm [shape: f32[8,256], index: 1, kind: input, shape index: {}]   ;;  %s182_s2 = inlined_call_operand.hbm [shape: f32[8,256], index: 2, kind: output, shape index: {}]  }
   0x1   :  { %8 = vsyncpa [#allocation6], 0 }
   0x2   :  { %9 = vsyncpa [#allocation4], 0  ;;  %s153_s9 = smov [#allocation2]   ;;  %s154_s11 = smov [#allocation5]  }
   0x3   :  { %s16_s10 = sshll.u32 %s153_s9, 4  ;;  %s26_s12 = sshll.u32 %s154_s11, 4  ;;  %s17_s10 = int_to_ptr.vmem [resolvable:$true] %s16_s10  ;;  %s27_s12 = int_to_ptr.vmem [resolvable:$true] %s26_s12 }
   0x4   :  { %s95_s13 = scalar_lea.vmem %s17_s10, 256  ;;  %p100_p1 = scmp.lt.s32.totalorder %s17_s10, %s17_s10 }
   0x5   :  { %p96_p0 = scmp.ne.s32.totalorder %s17_s10, %s95_s13  ;;  %p101_p2 = scmp.lt.s32.totalorder %s95_s13, %s95_s13 }
   0x7   :  { %p102_p3 = por %p101_p2, %p100_p1 }
   0x9   :  { %p103_p4 = pnand %p102_p3, %p96_p0 }
   0xb   :  { %106 = shalt.err (!%p103_p4)
}
   0xc   :  { %19 = dma.hbm_to_vmem [thread:$0]  %s180_s0, 256, %s17_s10, [#allocation3]  }
   0xd   :  { %s115_s16 = scalar_lea.vmem %s27_s12, 256  ;;  %p120_p6 = scmp.lt.s32.totalorder %s27_s12, %s27_s12 }
   0xe   :  { %p116_p5 = scmp.ne.s32.totalorder %s27_s12, %s115_s16  ;;  %p121_p7 = scmp.lt.s32.totalorder %s115_s16, %s115_s16 }
  0x10   :  { %p122_p8 = por %p121_p7, %p120_p6 }
  0x12   :  { %p123_p9 = pnand %p122_p8, %p116_p5 }
  0x14   :  { %126 = shalt.err (!%p123_p9)
}
  0x15   :  { %29 = dma.hbm_to_vmem [thread:$0]  %s181_s1, 256, %s27_s12, [#allocation6]  }
  0x16   :  { %147 = dma.done.wait [#allocation3], 256  }
  0x17   :  { %148 = vsyncadd [#allocation3], 4294967040 }
  0x18   :  { %149 = dma.done.wait [#allocation6], 256  }
  0x19   :  { %150 = vsyncadd [#allocation6], 4294967040  ;;  %v36_v0 = vld [vmem:[#allocation2] sm:$0xff]  ;;  %v37_v1 = vld [vmem:[#allocation2 + $0x8] sm:$0xff]  ;;  %s155_s0 = smov [#allocation7]  }
  0x1a   :  { %v74_v2 = vmul.f32 -1.442695, %v36_v0  ;;  %v75_v3 = vmul.f32 -1.442695, %v37_v1  ;;  %v38_v9 = vld [vmem:[#allocation5] sm:$0xff]  ;;  %v39_v12 = vld [vmem:[#allocation5 + $0x8] sm:$0xff] }
  0x1b   :  { %s64_s1 = sshll.u32 %s155_s0, 4  ;;  %s65_s1 = int_to_ptr.vmem [resolvable:$true] %s64_s1 }
  0x1c   :  { %79 = vpow2.f32 %v74_v2  ;;  %s127_s19 = scalar_lea.vmem %s65_s1, 256  ;;  %p132_p11 = scmp.lt.s32.totalorder %s65_s1, %s65_s1 }
  0x1d   :  { %81 = vpow2.f32 %v75_v3  ;;  %p128_p10 = scmp.ne.s32.totalorder %s65_s1, %s127_s19  ;;  %p133_p12 = scmp.lt.s32.totalorder %s127_s19, %s127_s19 }
  0x1f   :  { %p134_p13 = por %p133_p12, %p132_p11 }
  0x21   :  { %p135_p0 = pnand %p134_p13, %p128_p10 }
  0x29   :  { %v80_v4 = vpop.eup %79 }
  0x2a   :  { %v82_v5 = vpop.eup %81  ;;  %v46_v6 = vadd.f32 1.0, %v80_v4 }
  0x2b   :  { %v47_v7 = vadd.f32 1.0, %v82_v5 }
  0x2c   :  { %83 = vrcp.f32 %v46_v6 }
  0x2d   :  { %85 = vrcp.f32 %v47_v7 }
  0x39   :  { %v84_v8 = vpop.eup %83 }
  0x3a   :  { %v86_v10 = vpop.eup %85  ;;  %v52_v11 = vmul.f32 %v84_v8, %v36_v0 }
  0x3b   :  { %v53_v13 = vmul.f32 %v86_v10, %v37_v1 }
  0x3c   :  { %v54_v14 = vmul.f32 %v52_v11, %v38_v9 }
  0x3d   :  { %v55_v15 = vmul.f32 %v53_v13, %v39_v12 }
  0x3e   :  { %56 = vst [vmem:[#allocation7] sm:$0xff] %v54_v14 }
  0x3f   :  { %57 = vst [vmem:[#allocation7 + $0x8] sm:$0xff] %v55_v15 }
  0x40   :  { %138 = shalt.err (!%p135_p0)
}
  0x41   :  { %67 = dma.vmem_to_hbm [thread:$0]  %s65_s1, 256, %s182_s2, [#allocation4]  }
  0x42   :  { %151 = dma.done.wait [#allocation4], 256  }
  0x43   :  { %152 = vsyncadd [#allocation4], 4294967040 }
  0x44   :  { %71 = vsyncpa [#allocation3], 1 }
  0x45   :  { %72 = vsyncpa [#allocation6], 1 }
  0x46   :  { %73 = vsyncpa [#allocation4], 1 }

</bundles_post_ra>
